<compile_context>
chip_gen: v6e
topology: v6e:2x2x1
jax: 0.10.0
libtpu: 0.0.40
codegen_flags: <defaults>
</compile_context>

<pallas_src>
import jax
import jax.numpy as jnp
from jax.experimental import pallas as pl
from jax.experimental.pallas import tpu as pltpu


def _qfunction_kernel(obs_ref, act_ref, w1o_ref, w1a_ref, b1_ref,
                      w2_ref, b2_ref, w3_ref, b3_ref, o_ref):
    # Layer 1: concat folded into two matmuls accumulating the same f32 result.
    h1 = jnp.dot(obs_ref[...], w1o_ref[...], preferred_element_type=jnp.float32)
    h1 = h1 + jnp.dot(act_ref[...], w1a_ref[...], preferred_element_type=jnp.float32)
    h1 = jnp.maximum(h1 + b1_ref[...], 0.0)

    # Layer 2: Linear + ReLU on the MXU.
    h2 = jnp.dot(h1, w2_ref[...], preferred_element_type=jnp.float32) + b2_ref[...]
    h2 = jnp.maximum(h2, 0.0)

    # Layer 3: output width is 1 -> lane reduction on VPU/XLU instead of an
    # N=1 MXU matmul. b3 is a scalar living in SMEM.
    q = jnp.sum(h2 * w3_ref[...], axis=-1, keepdims=True) + b3_ref[0, 0]
    o_ref[...] = q.astype(o_ref.dtype)


def qfunction_forward(obs, action, params, *, batch_tile=256):
    """Pallas forward pass of QFunction.

    obs:    (B, obs_dim)    float32
    action: (B, action_dim) float32
    params: dict with
        w1_obs (obs_dim, H), w1_act (action_dim, H), b1 (1, H),
        w2 (H, H), b2 (1, H), w3_row (1, H), b3 (1, 1)
    returns (B, 1) float32
    """
    obs = obs.astype(jnp.float32)
    action = action.astype(jnp.float32)
    B, d_obs = obs.shape
    _, d_act = action.shape
    H = params["w1_obs"].shape[1]

    # Batch tile: multiple of 8 (sublane), no larger than the padded batch.
    # At these (tiny, f32) weight sizes the resident-weight VMEM footprint is
    # negligible, so a 256-row tile stays far under the default scoped VMEM
    # limit on every generation (v7x included).
    tb = max(8, min(batch_tile, ((B + 7) // 8) * 8))
    n_tiles = pl.cdiv(B, tb)
    b_pad = n_tiles * tb
    if b_pad != B:
        obs = jnp.pad(obs, ((0, b_pad - B), (0, 0)))
        action = jnp.pad(action, ((0, b_pad - B), (0, 0)))

    # Activation / output tiles walk the batch; weights stay VMEM-resident.
    tile = lambda shape: pl.BlockSpec(shape, lambda i: (i, 0))
    resident = lambda shape: pl.BlockSpec(shape, lambda i: (0, 0))

    out = pl.pallas_call(
        _qfunction_kernel,
        out_shape=jax.ShapeDtypeStruct((b_pad, 1), jnp.float32),
        grid=(n_tiles,),
        in_specs=[
            tile((tb, d_obs)),                       # obs tile
            tile((tb, d_act)),                       # action tile
            resident(params["w1_obs"].shape),        # W1 (obs rows)
            resident(params["w1_act"].shape),        # W1 (action rows)
            resident(params["b1"].shape),            # b1 (1, H)
            resident(params["w2"].shape),            # W2 (H, H)
            resident(params["b2"].shape),            # b2 (1, H)
            resident(params["w3_row"].shape),        # W3 as a (1, H) row
            pl.BlockSpec(memory_space=pltpu.MemorySpace.SMEM),  # b3 scalar
        ],
        out_specs=tile((tb, 1)),
        compiler_params=pltpu.CompilerParams(
            dimension_semantics=("parallel",)),
    )(obs, action,
      params["w1_obs"], params["w1_act"], params["b1"],
      params["w2"], params["b2"], params["w3_row"], params["b3"])

    return out[:B]


def init_qfunction_params(key, obs_dim, action_dim, hidden_dim):
    """Deterministic synthetic init matching the PyTorch module's shapes.

    PyTorch nn.Linear stores W as (out, in); we store the transpose (in, out).
    W1 is additionally split into its obs/action row blocks so the kernel can
    fold the concat into two matmuls. W3 is stored as a (1, H) row for the
    in-kernel lane reduction.
    """
    in_dim = obs_dim + action_dim
    k1, k2, k3, k4, k5, k6 = jax.random.split(key, 6)

    def uinit(k, shape, fan_in):
        bound = 1.0 / jnp.sqrt(fan_in)
        return jax.random.uniform(k, shape, jnp.float32, -bound, bound)

    w1 = uinit(k1, (in_dim, hidden_dim), in_dim)
    return {
        "w1_obs": w1[:obs_dim],
        "w1_act": w1[obs_dim:],
        "b1": uinit(k2, (1, hidden_dim), in_dim),
        "w2": uinit(k3, (hidden_dim, hidden_dim), hidden_dim),
        "b2": uinit(k4, (1, hidden_dim), hidden_dim),
        "w3_row": uinit(k5, (1, hidden_dim), hidden_dim),
        "b3": uinit(k6, (1, 1), hidden_dim),
    }


def qfunction_reference(obs, action, params):
    """Pure-JAX reference (mirrors the PyTorch forward)."""
    x = jnp.concatenate([obs, action], axis=1)
    w1 = jnp.concatenate([params["w1_obs"], params["w1_act"]], axis=0)
    h1 = jnp.maximum(x @ w1 + params["b1"], 0.0)
    h2 = jnp.maximum(h1 @ params["w2"] + params["b2"], 0.0)
    return h2 @ params["w3_row"].T + params["b3"]


if __name__ == "__main__":
    # Small shapes consistent with the module's forward.
    B, OBS_DIM, ACT_DIM, HIDDEN = 8, 16, 4, 32

    key = jax.random.PRNGKey(0)
    k_obs, k_act, k_params = jax.random.split(key, 3)

    obs = jax.random.normal(k_obs, (B, OBS_DIM), jnp.float32)
    action = jax.random.normal(k_act, (B, ACT_DIM), jnp.float32)
    params = init_qfunction_params(k_params, OBS_DIM, ACT_DIM, HIDDEN)

    q = qfunction_forward(obs, action, params)
    q = jax.block_until_ready(q)

    q_ref = qfunction_reference(obs, action, params)
    assert q.shape == (B, 1), q.shape
    assert jnp.allclose(q, q_ref, atol=1e-5, rtol=1e-5), "mismatch vs reference"

    print("KERNEL_OK")
</pallas_src>

<mosaic_0001>
module attributes {stable_mosaic.version = 11 : i64} {
  func.func @_qfunction_kernel(%arg0: i32, %arg1: memref<8x16xf32, #tpu.memory_space<vmem>>, %arg2: memref<8x4xf32, #tpu.memory_space<vmem>>, %arg3: memref<16x32xf32, #tpu.memory_space<vmem>>, %arg4: memref<4x32xf32, #tpu.memory_space<vmem>>, %arg5: memref<1x32xf32, #tpu.memory_space<vmem>>, %arg6: memref<32x32xf32, #tpu.memory_space<vmem>>, %arg7: memref<1x32xf32, #tpu.memory_space<vmem>>, %arg8: memref<1x32xf32, #tpu.memory_space<vmem>>, %arg9: memref<1x1xf32, #tpu.memory_space<smem>>, %arg10: memref<8x1xf32, #tpu.memory_space<vmem>>) attributes {dimension_semantics = [#tpu.dimension_semantics<parallel>], iteration_bounds = array<i64: 1>, scalar_prefetch = 0 : i64, scratch_operands = 0 : i64, tpu.core_type = #tpu.core_type<tc>, window_params = [{transform_indices = @transform_0, window_bounds = array<i64: 8, 16>}, {transform_indices = @transform_1, window_bounds = array<i64: 8, 4>}, {pipeline_mode = #tpu.pipeline_mode<synchronous>, transform_indices = @transform_2, window_bounds = array<i64: 16, 32>}, {pipeline_mode = #tpu.pipeline_mode<synchronous>, transform_indices = @transform_3, window_bounds = array<i64: 4, 32>}, {pipeline_mode = #tpu.pipeline_mode<synchronous>, transform_indices = @transform_4, window_bounds = array<i64: 1, 32>}, {pipeline_mode = #tpu.pipeline_mode<synchronous>, transform_indices = @transform_5, window_bounds = array<i64: 32, 32>}, {pipeline_mode = #tpu.pipeline_mode<synchronous>, transform_indices = @transform_6, window_bounds = array<i64: 1, 32>}, {pipeline_mode = #tpu.pipeline_mode<synchronous>, transform_indices = @transform_7, window_bounds = array<i64: 1, 32>}, {transform_indices = @transform_8, window_bounds = array<i64: 1, 1>}, {transform_indices = @transform_9, window_bounds = array<i64: 8, 1>}]} {
    %c0 = arith.constant 0 : index
    %c0_0 = arith.constant 0 : index
    %0 = vector.load %arg1[%c0, %c0_0] : memref<8x16xf32, #tpu.memory_space<vmem>>, vector<8x16xf32>
    %c0_1 = arith.constant 0 : index
    %c0_2 = arith.constant 0 : index
    %1 = vector.load %arg3[%c0_1, %c0_2] : memref<16x32xf32, #tpu.memory_space<vmem>>, vector<16x32xf32>
    %cst = arith.constant dense<0.000000e+00> : vector<8x32xf32>
    %2 = tpu.matmul %0, %1, %cst {dimension_numbers = #tpu.dot_dimension_numbers<[1], [0], [0], [1], [0, 0, 1, 1], [], []>} : vector<8x16xf32>, vector<16x32xf32>, vector<8x32xf32> -> vector<8x32xf32>
    %c0_3 = arith.constant 0 : index
    %c0_4 = arith.constant 0 : index
    %3 = vector.load %arg2[%c0_3, %c0_4] : memref<8x4xf32, #tpu.memory_space<vmem>>, vector<8x4xf32>
    %c0_5 = arith.constant 0 : index
    %c0_6 = arith.constant 0 : index
    %4 = vector.load %arg4[%c0_5, %c0_6] : memref<4x32xf32, #tpu.memory_space<vmem>>, vector<4x32xf32>
    %cst_7 = arith.constant dense<0.000000e+00> : vector<8x32xf32>
    %5 = tpu.matmul %3, %4, %cst_7 {dimension_numbers = #tpu.dot_dimension_numbers<[1], [0], [0], [1], [0, 0, 1, 1], [], []>} : vector<8x4xf32>, vector<4x32xf32>, vector<8x32xf32> -> vector<8x32xf32>
    %6 = arith.addf %2, %5 : vector<8x32xf32>
    %c0_8 = arith.constant 0 : index
    %c0_9 = arith.constant 0 : index
    %7 = vector.load %arg5[%c0_8, %c0_9] : memref<1x32xf32, #tpu.memory_space<vmem>>, vector<1x32xf32>
    %8 = vector.broadcast %7 : vector<1x32xf32> to vector<8x32xf32>
    %9 = arith.addf %6, %8 : vector<8x32xf32>
    %cst_10 = arith.constant 0.000000e+00 : f32
    %10 = vector.broadcast %cst_10 : f32 to vector<8x32xf32>
    %11 = arith.maximumf %9, %10 : vector<8x32xf32>
    %c0_11 = arith.constant 0 : index
    %c0_12 = arith.constant 0 : index
    %12 = vector.load %arg6[%c0_11, %c0_12] : memref<32x32xf32, #tpu.memory_space<vmem>>, vector<32x32xf32>
    %cst_13 = arith.constant dense<0.000000e+00> : vector<8x32xf32>
    %13 = tpu.matmul %11, %12, %cst_13 {dimension_numbers = #tpu.dot_dimension_numbers<[1], [0], [0], [1], [0, 0, 1, 1], [], []>} : vector<8x32xf32>, vector<32x32xf32>, vector<8x32xf32> -> vector<8x32xf32>
    %c0_14 = arith.constant 0 : index
    %c0_15 = arith.constant 0 : index
    %14 = vector.load %arg7[%c0_14, %c0_15] : memref<1x32xf32, #tpu.memory_space<vmem>>, vector<1x32xf32>
    %15 = vector.broadcast %14 : vector<1x32xf32> to vector<8x32xf32>
    %16 = arith.addf %13, %15 : vector<8x32xf32>
    %cst_16 = arith.constant 0.000000e+00 : f32
    %17 = vector.broadcast %cst_16 : f32 to vector<8x32xf32>
    %18 = arith.maximumf %16, %17 : vector<8x32xf32>
    %c0_17 = arith.constant 0 : index
    %c0_18 = arith.constant 0 : index
    %19 = vector.load %arg8[%c0_17, %c0_18] : memref<1x32xf32, #tpu.memory_space<vmem>>, vector<1x32xf32>
    %20 = vector.broadcast %19 : vector<1x32xf32> to vector<8x32xf32>
    %21 = arith.mulf %18, %20 : vector<8x32xf32>
    %cst_19 = arith.constant dense<0.000000e+00> : vector<8xf32>
    %22 = vector.multi_reduction <add>, %21, %cst_19 [1] : vector<8x32xf32> to vector<8xf32>
    %23 = vector.shape_cast %22 : vector<8xf32> to vector<8x1xf32>
    %c0_20 = arith.constant 0 : index
    %c0_21 = arith.constant 0 : index
    %24 = memref.load %arg9[%c0_20, %c0_21] : memref<1x1xf32, #tpu.memory_space<smem>>
    %25 = vector.broadcast %24 : f32 to vector<8x1xf32>
    %26 = arith.addf %23, %25 : vector<8x1xf32>
    %c0_22 = arith.constant 0 : index
    %c0_23 = arith.constant 0 : index
    %27 = vector.load %arg10[%c0_22, %c0_23] : memref<8x1xf32, #tpu.memory_space<vmem>>, vector<8x1xf32>
    tpu.vector_store %arg10[%c0_22, %c0_23], %26 {strides = array<i32>} : memref<8x1xf32, #tpu.memory_space<vmem>>, vector<8x1xf32>,
    return
  }
  func.func @transform_0(%arg0: i32) -> (i32, i32) {
    %c0_i32 = arith.constant 0 : i32
    %c0_i32_0 = arith.constant 0 : i32
    return %arg0, %c0_i32 : i32, i32
  }
  func.func @transform_1(%arg0: i32) -> (i32, i32) {
    %c0_i32 = arith.constant 0 : i32
    %c0_i32_0 = arith.constant 0 : i32
    return %arg0, %c0_i32 : i32, i32
  }
  func.func @transform_2(%arg0: i32) -> (i32, i32) {
    %c0_i32 = arith.constant 0 : i32
    %c0_i32_0 = arith.constant 0 : i32
    %c0_i32_1 = arith.constant 0 : i32
    return %c0_i32, %c0_i32_0 : i32, i32
  }
  func.func @transform_3(%arg0: i32) -> (i32, i32) {
    %c0_i32 = arith.constant 0 : i32
    %c0_i32_0 = arith.constant 0 : i32
    %c0_i32_1 = arith.constant 0 : i32
    return %c0_i32, %c0_i32_0 : i32, i32
  }
  func.func @transform_4(%arg0: i32) -> (i32, i32) {
    %c0_i32 = arith.constant 0 : i32
    %c0_i32_0 = arith.constant 0 : i32
    %c0_i32_1 = arith.constant 0 : i32
    return %c0_i32, %c0_i32_0 : i32, i32
  }
  func.func @transform_5(%arg0: i32) -> (i32, i32) {
    %c0_i32 = arith.constant 0 : i32
    %c0_i32_0 = arith.constant 0 : i32
    %c0_i32_1 = arith.constant 0 : i32
    return %c0_i32, %c0_i32_0 : i32, i32
  }
  func.func @transform_6(%arg0: i32) -> (i32, i32) {
    %c0_i32 = arith.constant 0 : i32
    %c0_i32_0 = arith.constant 0 : i32
    %c0_i32_1 = arith.constant 0 : i32
    return %c0_i32, %c0_i32_0 : i32, i32
  }
  func.func @transform_7(%arg0: i32) -> (i32, i32) {
    %c0_i32 = arith.constant 0 : i32
    %c0_i32_0 = arith.constant 0 : i32
    %c0_i32_1 = arith.constant 0 : i32
    return %c0_i32, %c0_i32_0 : i32, i32
  }
  func.func @transform_8(%arg0: i32) -> (i32, i32) {
    %c0_i32 = arith.constant 0 : i32
    %c0_i32_0 = arith.constant 0 : i32
    %c0_i32_1 = arith.constant 0 : i32
    return %c0_i32, %c0_i32_0 : i32, i32
  }
  func.func @transform_9(%arg0: i32) -> (i32, i32) {
    %c0_i32 = arith.constant 0 : i32
    %c0_i32_0 = arith.constant 0 : i32
    return %arg0, %c0_i32 : i32, i32
  }
}

</mosaic_0001>

<bundles_post_ra>
// kernel: tpu_custom_call.1
= control target key start
LH: loop header
LB: loop body
LE: loop exit
PB: predicated region body
PF: predicated region fallthrough
CT: control target
= control target key end

     0   :  { %15 = vsyncpa [#allocation4], 0  ;;  %s545_s0 = inlined_call_operand.hbm [shape: f32[8,16], index: 0, kind: input, shape index: {}]   ;;  %s546_s1 = inlined_call_operand.vmem [shape: f32[8,4], index: 1, kind: input, shape index: {}]   ;;  %s547_s2 = inlined_call_operand.vmem [shape: f32[16,32], index: 2, kind: input, shape index: {}]   ;;  %s548_s3 = inlined_call_operand.hbm [shape: f32[4,32], index: 3, kind: input, shape index: {}]   ;;  %s549_s4 = inlined_call_operand.vmem [shape: f32[1,32], index: 4, kind: input, shape index: {}]   ;;  %s550_s5 = inlined_call_operand.hbm [shape: f32[32,32], index: 5, kind: input, shape index: {}]   ;;  %s551_s6 = inlined_call_operand.vmem [shape: f32[1,32], index: 6, kind: input, shape index: {}]   ;;  %s552_s7 = inlined_call_operand.vmem [shape: f32[1,32], index: 7, kind: input, shape index: {}]   ;;  %s553_s8 = inlined_call_operand.<no memory space> [shape: f32[1,1], index: 8, kind: input, shape index: {}]   ;;  %s554_s9 = inlined_call_operand.vmem [shape: f32[8,1], index: 9, kind: output, shape index: {}]  }
   0x1   :  { %16 = vsyncpa [#allocation6], 0  ;;  %s455_s30 = smov [#allocation5]   ;;  %s456_s11 = smov [#allocation3]  }
   0x2   :  { %s37_s10 = sshll.u32 %s455_s30, 4  ;;  %s23_s12 = sshll.u32 %s456_s11, 4  ;;  %s38_s10 = int_to_ptr.vmem [resolvable:$true] %s37_s10  ;;  %s24_s12 = int_to_ptr.vmem [resolvable:$true] %s23_s12 }
   0x3   :  { %s399_s13 = scalar_lea.vmem %s38_s10, 64  ;;  %p404_p1 = scmp.lt.s32.totalorder %s38_s10, %s38_s10 }
   0x4   :  { %p400_p0 = scmp.ne.s32.totalorder %s38_s10, %s399_s13  ;;  %p405_p2 = scmp.lt.s32.totalorder %s399_s13, %s399_s13 }
   0x6   :  { %p406_p3 = por %p405_p2, %p404_p1 }
   0x8   :  { %p407_p4 = pnand %p406_p3, %p400_p0 }
   0xa   :  { %410 = shalt.err (!%p407_p4)
}
   0xb   :  { %40 = dma.hbm_to_vmem [thread:$0]  %s548_s3, 64, %s38_s10, [#allocation6]  }
   0xc   :  { %s419_s16 = scalar_lea.vmem %s24_s12, 128  ;;  %p424_p6 = scmp.lt.s32.totalorder %s24_s12, %s24_s12 }
   0xd   :  { %p420_p5 = scmp.ne.s32.totalorder %s24_s12, %s419_s16  ;;  %p425_p7 = scmp.lt.s32.totalorder %s419_s16, %s419_s16 }
   0xf   :  { %p426_p8 = por %p425_p7, %p424_p6 }
  0x11   :  { %p427_p9 = pnand %p426_p8, %p420_p5 }
  0x13   :  { %430 = shalt.err (!%p427_p9)
}
  0x14   :  { %26 = dma.hbm_to_vmem [thread:$0]  %s545_s0, 128, %s24_s12, [#allocation4]  }
  0x15   :  { %s457_s19 = smov [#allocation7]  }
  0x16   :  { %s48_s20 = sshll.u32 %s457_s19, 4  ;;  %s49_s20 = int_to_ptr.vmem [resolvable:$true] %s48_s20 }
  0x17   :  { %s439_s21 = scalar_lea.vmem %s49_s20, 512  ;;  %p444_p11 = scmp.lt.s32.totalorder %s49_s20, %s49_s20 }
  0x18   :  { %p440_p10 = scmp.ne.s32.totalorder %s49_s20, %s439_s21  ;;  %p445_p12 = scmp.lt.s32.totalorder %s439_s21, %s439_s21 }
  0x1a   :  { %p446_p13 = por %p445_p12, %p444_p11 }
  0x1c   :  { %p447_p0 = pnand %p446_p13, %p440_p10 }
  0x1e   :  { %450 = shalt.err (!%p447_p0)
}
  0x1f   :  { %s458_s3 = smov 128   ;;  %s459_s22 = smov 8  }
  0x20   :  { %54 = dma.hbm_to_vmem [thread:$0]  %s550_s5, 512, %s49_s20, [#allocation6], %s458_s3, %s458_s3, %s459_s22  }
  0x21   :  { %451 = dma.done.wait [#allocation4], 128  }
  0x22   :  { %452 = vsyncadd [#allocation4], 4294967168 }
  0x23   :  { %453 = dma.done.wait [#allocation6], 576  }
  0x24   :  { %454 = vsyncadd [#allocation6], 4294966720  ;;  %v460_v0 = vmov 0.0   ;;  %vm461_vm0 = vmmov 0   ;;  %vm79_vm1 = vcmask 1043456   ;;  %vm75_vm2 = vcmask 31744  }
  0x25   :  { %361 = vmatprep.subr.mxu1 %v460_v0  ;;  %363 = vmatprep.mubr.msk.f32.mxu1 %vm461_vm0, %v460_v0  ;;  %v74_v1 = vld [vmem:[#allocation5] sm:$0xf]  ;;  %v73_v2 = vld [vmem:[%s546_s1] sm:$0xff]  ;;  %vm153_vm3 = vcmask 130048   ;;  %v237_v8 = vld [vmem:[#allocation7 + $0x8] sm:$0xff]  ;;  %vm247_vm4 = vcmask 261120   ;;  %v334_v26 = vstv %s553_s8 }
  0x26   :  { %373 = vmatprep.subr.mxu0 %v460_v0  ;;  %381 = vmatprep.mubr.msk.f32.mxu0 %vm461_vm0, %v460_v0  ;;  %v72_v3 = vld [vmem:[%s547_s2 + $0x8] sm:$0xff]  ;;  %v71_v4 = vld [vmem:[%s547_s2] sm:$0xff]  ;;  %vm336_vm5 = vcmask 7168  }
  0x27   :  { %362 = vmatpush3.msk.msra.mxu1 %vm79_vm1, %v74_v1  ;;  %v70_v5 = vld [vmem:[#allocation3] sm:$0xff]  ;;  %v236_v9 = vld [vmem:[#allocation7] sm:$0xff] }
  0x28   :  { %364 = vmatmul.mubr.msk.f32.vlgmr.msra.gmra.mxu1 %vm75_vm2, %v73_v2  ;;  %366 = vmatprep.subr.mxu1 %v460_v0  ;;  %v239_v6 = vld [vmem:[#allocation7 + $0x18] sm:$0xff]  ;;  %v238_v7 = vld [vmem:[#allocation7 + $0x10] sm:$0xff] }
  0x29   :  { %367 = vmatpush3.msra.mxu1 %v72_v3  ;;  %370 = vmatprep.mubr.msk.f32.mxu1 %vm461_vm0, %v460_v0  ;;  %v347_v13 = vld [vmem:[%s549_s4] ss:$0 sm:$0xff] }
  0x2a   :  { %368 = vmatprep.subr.mxu1 %v460_v0  ;;  %374 = vmatpush3.msra.mxu0 %v239_v6  ;;  %v348_v18 = vld [vmem:[%s551_s6] ss:$0 sm:$0xff] }
  0x2b   :  { %369 = vmatpush3.msra.mxu1 %v71_v4  ;;  %375 = vmatprep.subr.mxu0 %v460_v0  ;;  %v350_v22 = vld [vmem:[%s552_s7] ss:$0 sm:$0xff] }
  0x2c   :  { %371 = vmatmul.mubr.msk.f32.vlgmr.msra.gmra.mxu1 %vm153_vm3, %v70_v5  ;;  %376 = vmatpush3.msra.mxu0 %v238_v7 }
  0x2d   :  { %377 = vmatprep.subr.mxu0 %v460_v0 }
  0x2e   :  { %378 = vmatpush3.msra.mxu0 %v237_v8 }
  0x2f   :  { %379 = vmatprep.subr.mxu0 %v460_v0 }
  0x30   :  { %380 = vmatpush3.msra.mxu0 %v236_v9 }
  0xe8   :  { %v149_v10 = vpop.f32.mrf.mxu1 }
  0xea   :  { %v365_v11 = vpop.f32.mrf.mxu1 }
  0xec   :  { %v223_v12 = vpop.f32.mrf.mxu1 }
  0xed   :  { %v224_v14 = vadd.f32 %v223_v12, %v149_v10 }
  0xee   :  { %v372_v15 = vpop.f32.mrf.mxu1 }
  0xef   :  { %v234_v16 = vadd.f32 %v347_v13, %v224_v14 }
  0xf1   :  { %v235_v17 = vmax.f32 %v234_v16, 0.0 }
  0xf3   :  { %382 = vmatmul.mubr.msk.f32.vlgmr.msra.gmra.mxu0 %vm247_vm4, %v235_v17 }
 0x1b3   :  { %v317_v19 = vpop.f32.mrf.mxu0 }
 0x1b4   :  { %v318_v20 = vadd.f32 %v348_v18, %v317_v19 }
 0x1b5   :  { %v383_v21 = vpop.f32.mrf.mxu0 }
 0x1b6   :  { %v321_v23 = vmax.f32 %v318_v20, 0.0 }
 0x1b8   :  { %v329_v24 = vmul.f32 %v350_v22, %v321_v23 }
 0x1ba   :  { %v330_v25 = vsel %vm247_vm4, %v329_v24, 0.0 }
 0x1bb   :  { %331 = vadd.xlane.f32.xlu0 %v330_v25 }
 0x244   :  { %v332_v27 = vpop.xlane.xlu0 %331 }
 0x245   :  { %v335_v28 = vadd.f32 %v334_v26, %v332_v27 }
 0x247   :  { %337 = vst.msk [vmem:[%s554_s9] sm:$0xff] %vm336_vm5, %v335_v28 }
 0x248   :  { %342 = vsyncpa [#allocation4], 1 }
 0x249   :  { %343 = vsyncpa [#allocation6], 1 }

</bundles_post_ra>
